<compile_context>
chip_gen: v7x
topology: tpu7x:2x2x1
jax: 0.10.0
libtpu: 0.0.40
codegen_flags: <defaults>
</compile_context>

<pallas_src>
import functools

import jax
import jax.numpy as jnp
from jax import lax
from jax.experimental import pallas as pl
from jax.experimental.pallas import tpu as pltpu


def _res_conv1d_kernel(d, bt, single_tile, compute_dtype,
                       x_ref, halo_ref, w1_ref, b1_ref, w2_ref, b2_ref, o_ref):
    """One grid step = `bt` batch elements x one length tile (channels-first NCL).

    x_ref    : (bt, C, TL)       un-activated input tile (also the residual source)
    halo_ref : (bt, 1, C, 2*d)   [left d | right d] pre-activation halo columns
    w1_ref   : (3, S, C)         conv1 taps, w1_ref[k] == torch_w1[:, :, k]
    b1_ref   : (S, 1)
    w2_ref   : (C, S)            1x1 conv weight
    b2_ref   : (C, 1)
    o_ref    : (bt, C, TL)
    """
    C, TL = x_ref.shape[1], x_ref.shape[2]

    # Loop-invariant reads / broadcasts hoisted out of the per-batch loop.
    w1_0 = w1_ref[0]
    w1_1 = w1_ref[1]
    w1_2 = w1_ref[2]
    w2 = w2_ref[...]
    b1 = b1_ref[...]
    b2 = b2_ref[...]
    if compute_dtype is not None:
        w1_0, w1_1, w1_2, w2 = (w.astype(compute_dtype)
                                for w in (w1_0, w1_1, w1_2, w2))

    lane = lax.broadcasted_iota(jnp.int32, (C, TL), 1)
    left_mask = lane < d
    right_mask = lane >= TL - d

    def one_batch(b):
        x = x_ref[b]                           # (C, TL) aligned read; residual source
        h = x * jax.nn.sigmoid(x)              # silu; silu(0)=0 keeps zero padding exact

        # Shifted taps via XLU rotations + a boundary-lane splice (no concat slabs).
        h_lag_roll = pltpu.roll(h, shift=d, axis=1)         # lane l -> h[l-d] (wraps)
        h_lead_roll = pltpu.roll(h, shift=TL - d, axis=1)   # lane l -> h[l+d] (wraps)
        if single_tile:
            # Halo is all zeros (global zero padding): splice scalar 0 at the edges.
            h_lag = jnp.where(left_mask, 0.0, h_lag_roll)
            h_lead = jnp.where(right_mask, 0.0, h_lead_roll)
        else:
            halo = halo_ref[b, 0]                           # (C, 2d) pre-activation
            hh = halo * jax.nn.sigmoid(halo)
            pieces = [hh[:, :d]]
            if TL > 2 * d:
                pieces.append(jnp.zeros((C, TL - 2 * d), h.dtype))
            pieces.append(hh[:, d:])
            hh_full = jnp.concatenate(pieces, axis=1)       # halo at lanes [0,d)&[TL-d,TL)
            h_lag = jnp.where(left_mask, hh_full, h_lag_roll)
            h_lead = jnp.where(right_mask, hh_full, h_lead_roll)

        hc, h_lag_c, h_lead_c = h, h_lag, h_lead
        if compute_dtype is not None:                       # cast late, accumulate in f32
            hc, h_lag_c, h_lead_c = (v.astype(compute_dtype)
                                     for v in (h, h_lag, h_lead))

        # Dilated k=3 conv = three accumulating K=C matmuls (kernel is memory-bound;
        # no fused-K operand slab is ever materialized).
        y1 = (jnp.dot(w1_0, h_lag_c, preferred_element_type=jnp.float32)
              + jnp.dot(w1_1, hc, preferred_element_type=jnp.float32)
              + jnp.dot(w1_2, h_lead_c, preferred_element_type=jnp.float32)
              + b1)                                         # (S, TL)
        h2 = y1 * jax.nn.sigmoid(y1)                        # silu
        if compute_dtype is not None:
            h2 = h2.astype(compute_dtype)
        y2 = jnp.dot(w2, h2, preferred_element_type=jnp.float32) + b2   # (C, TL)
        o_ref[b] = (y2 + x).astype(o_ref.dtype)             # residual add

    if bt == 1:
        one_batch(0)
    else:
        # fori_loop (not a Python unroll) bounds the live ranges of the per-batch
        # temporaries so only one batch element's slabs are resident at a time.
        def body(b, carry):
            one_batch(b)
            return carry
        lax.fori_loop(0, bt, body, 0)


def _vmem_limit_bytes():
    # Generation-aware scoped-VMEM budget: ~3/4 of physical per-core VMEM
    # (v5e/v6e 128 MiB -> 96 MiB, v7x 64 MiB -> 48 MiB), never above 96 MiB.
    cap = 64 * 1024 * 1024
    try:
        info = pltpu.get_tpu_info()
        cap = int(getattr(info, "vmem_capacity_bytes", 0)) or cap
    except Exception:
        pass
    return min((cap * 3) // 4, 96 * 1024 * 1024)


def _choose_tiles(N, C, S, L, vmem_limit, max_tile_l=None):
    # Batch tile: largest divisor of N that is <= 8 (amortize ~0.35us/step overhead).
    bt = 1
    for cand in range(1, min(N, 8) + 1):
        if N % cand == 0:
            bt = cand
    if max_tile_l is None:
        # Size TL from the total VMEM footprint, not just the x block:
        #   double-buffered in + out blocks            : 4 * bt * X
        #   live fp32 temporaries for ONE batch element: ~(4 + 2*ceil(S/C)) * X
        # with X = C * TL * 4 bytes.  Cap X at 4 MiB (HBM-roofline plateau).
        ratio = -(-S // C)
        x_block_budget = vmem_limit // (4 * bt + 4 + 2 * ratio)
        x_block_budget = min(x_block_budget, 4 * 1024 * 1024)
        max_tile_l = max(128, (x_block_budget // (C * 4)) // 128 * 128)
    max_tile_l = max(128, (max_tile_l // 128) * 128)
    # Lane-dense output: TL is always a multiple of 128 (L is padded if needed).
    TL = min(max_tile_l, -(-L // 128) * 128)
    T = -(-L // TL)
    return bt, TL, T


def res_conv1d_block(x, w1, b1, w2, b2, *, dilation=1, compute_dtype=None,
                     max_tile_l=None):
    """x : (N, C, L) NCL.  w1: (S, C, 3), b1: (S,).  w2: (C, S, 1), b2: (C,)."""
    N, C, L = x.shape
    S = w1.shape[0]
    d = int(dilation)
    assert d >= 1
    itemsize = jnp.dtype(x.dtype).itemsize

    vmem_limit = _vmem_limit_bytes()
    bt, TL, T = _choose_tiles(N, C, S, L, vmem_limit, max_tile_l)
    assert 2 * d <= TL, "dilation too large for the chosen length tile"
    L_pad = T * TL

    # Right-pad to a multiple of the (128-aligned) tile: lane-dense stores, and the
    # padded zeros behave exactly like PyTorch's conv zero padding (silu(0)=0).
    x_p = x if L_pad == L else jnp.pad(x, ((0, 0), (0, 0), (0, L_pad - L)))

    # Tiny per-tile halo: left/right `d` pre-activation columns of each tile
    # (zeros at the global edges -> identical to PyTorch's conv zero padding).
    if T == 1:
        halo = jnp.zeros((N, 1, C, 2 * d), x.dtype)
    else:
        xr = x_p.reshape(N, C, T, TL)
        heads = xr[:, :, :, :d]
        tails = xr[:, :, :, TL - d:]
        zeros = jnp.zeros((N, C, 1, d), x.dtype)
        left = jnp.concatenate([zeros, tails[:, :, :-1, :]], axis=2)
        right = jnp.concatenate([heads[:, :, 1:, :], zeros], axis=2)
        halo = jnp.transpose(jnp.concatenate([left, right], axis=3), (0, 2, 1, 3))
    # halo: (N, T, C, 2*d)

    w1s = jnp.transpose(w1, (2, 0, 1))   # (3, S, C): w1s[k] == w1[:, :, k]
    w2f = w2[:, :, 0]                    # (C, S)
    b1f = b1.reshape(S, 1)
    b2f = b2.reshape(C, 1)

    kernel = functools.partial(_res_conv1d_kernel, d, bt, T == 1, compute_dtype)

    # Advisory cost estimate (3 K=C taps + 1x1 conv, both silus, halo included).
    flops = 2 * 4 * C * S * N * L_pad
    transcendentals = N * L_pad * (C + S) + N * T * C * 2 * d
    bytes_accessed = (itemsize * 2 * N * C * L_pad
                      + itemsize * N * T * C * 2 * d
                      + itemsize * (4 * C * S + S + C))

    out = pl.pallas_call(
        kernel,
        out_shape=jax.ShapeDtypeStruct((N, C, L_pad), x.dtype),
        grid=(N // bt, T),
        in_specs=[
            pl.BlockSpec((bt, C, TL), lambda b, j: (b, 0, j)),
            pl.BlockSpec((bt, 1, C, 2 * d), lambda b, j: (b, j, 0, 0)),
            pl.BlockSpec((3, S, C), lambda b, j: (0, 0, 0)),
            pl.BlockSpec((S, 1), lambda b, j: (0, 0)),
            pl.BlockSpec((C, S), lambda b, j: (0, 0)),
            pl.BlockSpec((C, 1), lambda b, j: (0, 0)),
        ],
        out_specs=pl.BlockSpec((bt, C, TL), lambda b, j: (b, 0, j)),
        compiler_params=pltpu.CompilerParams(
            dimension_semantics=("parallel", "parallel"),
            vmem_limit_bytes=vmem_limit,
        ),
        cost_estimate=pl.CostEstimate(
            flops=flops, transcendentals=transcendentals,
            bytes_accessed=bytes_accessed),
    )(x_p, halo, w1s, b1f, w2f, b2f)

    return out if L_pad == L else out[:, :, :L]


def _reference(x, w1, b1, w2, b2, *, dilation=1):
    """Pure-JAX reference matching the PyTorch module (NCL convs)."""
    silu = lambda v: v * jax.nn.sigmoid(v)
    h = silu(x)
    y1 = lax.conv_general_dilated(
        h, w1, window_strides=(1,), padding=[(dilation, dilation)],
        rhs_dilation=(dilation,), dimension_numbers=("NCH", "OIH", "NCH"),
    ) + b1[None, :, None]
    h2 = silu(y1)
    y2 = lax.conv_general_dilated(
        h2, w2, window_strides=(1,), padding=[(0, 0)],
        dimension_numbers=("NCH", "OIH", "NCH"),
    ) + b2[None, :, None]
    return y2 + x


if __name__ == "__main__":
    key = jax.random.PRNGKey(0)
    k_x, k_w1, k_b1, k_w2, k_b2, k_x2 = jax.random.split(key, 6)

    # Small shapes consistent with the module: batch=2, n_in=8, n_state=16, length=16.
    N, n_in, n_state, L = 2, 8, 16, 16
    x = jax.random.normal(k_x, (N, n_in, L), dtype=jnp.float32)
    w1 = 0.1 * jax.random.normal(k_w1, (n_state, n_in, 3), dtype=jnp.float32)
    b1 = 0.1 * jax.random.normal(k_b1, (n_state,), dtype=jnp.float32)
    w2 = 0.1 * jax.random.normal(k_w2, (n_in, n_state, 1), dtype=jnp.float32)
    b2 = 0.1 * jax.random.normal(k_b2, (n_in,), dtype=jnp.float32)

    out = jax.block_until_ready(res_conv1d_block(x, w1, b1, w2, b2, dilation=1))
    ref = _reference(x, w1, b1, w2, b2, dilation=1)
    assert out.shape == (N, n_in, L)
    assert jnp.allclose(out, ref, atol=2e-5, rtol=2e-5), "mismatch (single-tile path)"

    # Also exercise the tiled-length + halo path (dilation=2, L not a tile multiple).
    L2, d2 = 200, 2
    x2 = jax.random.normal(k_x2, (N, n_in, L2), dtype=jnp.float32)
    out2 = jax.block_until_ready(
        res_conv1d_block(x2, w1, b1, w2, b2, dilation=d2, max_tile_l=128))
    ref2 = _reference(x2, w1, b1, w2, b2, dilation=d2)
    assert out2.shape == (N, n_in, L2)
    assert jnp.allclose(out2, ref2, atol=2e-5, rtol=2e-5), "mismatch (tiled halo path)"

    print("KERNEL_OK")
</pallas_src>

<mosaic_0001>
module attributes {stable_mosaic.version = 11 : i64} {
  func.func @_res_conv1d_kernel(%arg0: i32, %arg1: i32, %arg2: memref<2x8x128xf32, #tpu.memory_space<vmem>>, %arg3: memref<2x1x8x2xf32, #tpu.memory_space<vmem>>, %arg4: memref<3x16x8xf32, #tpu.memory_space<vmem>>, %arg5: memref<16x1xf32, #tpu.memory_space<vmem>>, %arg6: memref<8x16xf32, #tpu.memory_space<vmem>>, %arg7: memref<8x1xf32, #tpu.memory_space<vmem>>, %arg8: memref<2x8x128xf32, #tpu.memory_space<vmem>>) attributes {dimension_semantics = [#tpu.dimension_semantics<parallel>, #tpu.dimension_semantics<parallel>], iteration_bounds = array<i64: 1, 1>, scalar_prefetch = 0 : i64, scratch_operands = 0 : i64, tpu.core_type = #tpu.core_type<tc>, window_params = [{transform_indices = @transform_0, window_bounds = array<i64: 2, 8, 128>}, {transform_indices = @transform_1, window_bounds = array<i64: 2, 1, 8, 2>}, {pipeline_mode = #tpu.pipeline_mode<synchronous>, transform_indices = @transform_2, window_bounds = array<i64: 3, 16, 8>}, {pipeline_mode = #tpu.pipeline_mode<synchronous>, transform_indices = @transform_3, window_bounds = array<i64: 16, 1>}, {pipeline_mode = #tpu.pipeline_mode<synchronous>, transform_indices = @transform_4, window_bounds = array<i64: 8, 16>}, {pipeline_mode = #tpu.pipeline_mode<synchronous>, transform_indices = @transform_5, window_bounds = array<i64: 8, 1>}, {transform_indices = @transform_6, window_bounds = array<i64: 2, 8, 128>}]} {
    %c0 = arith.constant 0 : index
    %c0_0 = arith.constant 0 : index
    %c0_1 = arith.constant 0 : index
    %0 = vector.load %arg4[%c0, %c0_0, %c0_1] : memref<3x16x8xf32, #tpu.memory_space<vmem>>, vector<1x16x8xf32>
    %1 = vector.shape_cast %0 : vector<1x16x8xf32> to vector<16x8xf32>
    %c1 = arith.constant 1 : index
    %c0_2 = arith.constant 0 : index
    %c0_3 = arith.constant 0 : index
    %2 = vector.load %arg4[%c1, %c0_2, %c0_3] : memref<3x16x8xf32, #tpu.memory_space<vmem>>, vector<1x16x8xf32>
    %3 = vector.shape_cast %2 : vector<1x16x8xf32> to vector<16x8xf32>
    %c2 = arith.constant 2 : index
    %c0_4 = arith.constant 0 : index
    %c0_5 = arith.constant 0 : index
    %4 = vector.load %arg4[%c2, %c0_4, %c0_5] : memref<3x16x8xf32, #tpu.memory_space<vmem>>, vector<1x16x8xf32>
    %5 = vector.shape_cast %4 : vector<1x16x8xf32> to vector<16x8xf32>
    %c0_6 = arith.constant 0 : index
    %c0_7 = arith.constant 0 : index
    %6 = vector.load %arg6[%c0_6, %c0_7] : memref<8x16xf32, #tpu.memory_space<vmem>>, vector<8x16xf32>
    %c0_8 = arith.constant 0 : index
    %c0_9 = arith.constant 0 : index
    %7 = vector.load %arg5[%c0_8, %c0_9] : memref<16x1xf32, #tpu.memory_space<vmem>>, vector<16x1xf32>
    %c0_10 = arith.constant 0 : index
    %c0_11 = arith.constant 0 : index
    %8 = vector.load %arg7[%c0_10, %c0_11] : memref<8x1xf32, #tpu.memory_space<vmem>>, vector<8x1xf32>
    %9 = tpu.iota {dimensions = array<i32: 1>} : vector<8x128xi32>
    %c1_i32 = arith.constant 1 : i32
    %10 = vector.broadcast %c1_i32 : i32 to vector<8x128xi32>
    %11 = arith.cmpi slt, %9, %10 : vector<8x128xi32>
    %c127_i32 = arith.constant 127 : i32
    %12 = vector.broadcast %c127_i32 : i32 to vector<8x128xi32>
    %13 = arith.cmpi sge, %9, %12 : vector<8x128xi32>
    %c0_i32 = arith.constant 0 : i32
    %c2_i32 = arith.constant 2 : i32
    %14 = arith.addi %c0_i32, %c2_i32 : i32
    %c1_i32_12 = arith.constant 1 : i32
    scf.for %arg9 = %c0_i32 to %14 step %c1_i32_12  : i32 {
      %15 = arith.index_cast %arg9 : i32 to index
      %c0_14 = arith.constant 0 : index
      %c0_15 = arith.constant 0 : index
      %16 = vector.load %arg2[%15, %c0_14, %c0_15] : memref<2x8x128xf32, #tpu.memory_space<vmem>>, vector<1x8x128xf32>
      %17 = vector.shape_cast %16 : vector<1x8x128xf32> to vector<8x128xf32>
      %18 = arith.negf %17 : vector<8x128xf32>
      %19 = math.exp %18 : vector<8x128xf32>
      %cst = arith.constant 1.000000e+00 : f32
      %20 = vector.broadcast %cst : f32 to vector<8x128xf32>
      %21 = arith.addf %20, %19 : vector<8x128xf32>
      %22 = arith.divf %20, %21 : vector<8x128xf32>
      %23 = arith.mulf %17, %22 : vector<8x128xf32>
      %c1_i32_16 = arith.constant 1 : i32
      %24 = tpu.dynamic_rotate %23 by %c1_i32_16 dim 1 : vector<8x128xf32>, i32 -> vector<8x128xf32>
      %c127_i32_17 = arith.constant 127 : i32
      %25 = tpu.dynamic_rotate %23 by %c127_i32_17 dim 1 : vector<8x128xf32>, i32 -> vector<8x128xf32>
      %cst_18 = arith.constant 0.000000e+00 : f32
      %26 = vector.broadcast %cst_18 : f32 to vector<8x128xf32>
      %27 = arith.select %11, %26, %24 : vector<8x128xi1>, vector<8x128xf32>
      %cst_19 = arith.constant 0.000000e+00 : f32
      %28 = vector.broadcast %cst_19 : f32 to vector<8x128xf32>
      %29 = arith.select %13, %28, %25 : vector<8x128xi1>, vector<8x128xf32>
      %cst_20 = arith.constant dense<0.000000e+00> : vector<16x128xf32>
      %30 = tpu.matmul %1, %27, %cst_20 {dimension_numbers = #tpu.dot_dimension_numbers<[1], [0], [0], [1], [0, 0, 1, 1], [], []>} : vector<16x8xf32>, vector<8x128xf32>, vector<16x128xf32> -> vector<16x128xf32>
      %cst_21 = arith.constant dense<0.000000e+00> : vector<16x128xf32>
      %31 = tpu.matmul %3, %23, %cst_21 {dimension_numbers = #tpu.dot_dimension_numbers<[1], [0], [0], [1], [0, 0, 1, 1], [], []>} : vector<16x8xf32>, vector<8x128xf32>, vector<16x128xf32> -> vector<16x128xf32>
      %32 = arith.addf %30, %31 : vector<16x128xf32>
      %cst_22 = arith.constant dense<0.000000e+00> : vector<16x128xf32>
      %33 = tpu.matmul %5, %29, %cst_22 {dimension_numbers = #tpu.dot_dimension_numbers<[1], [0], [0], [1], [0, 0, 1, 1], [], []>} : vector<16x8xf32>, vector<8x128xf32>, vector<16x128xf32> -> vector<16x128xf32>
      %34 = arith.addf %32, %33 : vector<16x128xf32>
      %35 = vector.broadcast %7 : vector<16x1xf32> to vector<16x128xf32>
      %36 = arith.addf %34, %35 : vector<16x128xf32>
      %37 = arith.negf %36 : vector<16x128xf32>
      %38 = math.exp %37 : vector<16x128xf32>
      %cst_23 = arith.constant 1.000000e+00 : f32
      %39 = vector.broadcast %cst_23 : f32 to vector<16x128xf32>
      %40 = arith.addf %39, %38 : vector<16x128xf32>
      %41 = arith.divf %39, %40 : vector<16x128xf32>
      %42 = arith.mulf %36, %41 : vector<16x128xf32>
      %cst_24 = arith.constant dense<0.000000e+00> : vector<8x128xf32>
      %43 = tpu.matmul %6, %42, %cst_24 {dimension_numbers = #tpu.dot_dimension_numbers<[1], [0], [0], [1], [0, 0, 1, 1], [], []>} : vector<8x16xf32>, vector<16x128xf32>, vector<8x128xf32> -> vector<8x128xf32>
      %44 = vector.broadcast %8 : vector<8x1xf32> to vector<8x128xf32>
      %45 = arith.addf %43, %44 : vector<8x128xf32>
      %46 = arith.addf %45, %17 : vector<8x128xf32>
      %47 = arith.index_cast %arg9 : i32 to index
      %c0_25 = arith.constant 0 : index
      %c0_26 = arith.constant 0 : index
      %48 = vector.load %arg8[%47, %c0_25, %c0_26] : memref<2x8x128xf32, #tpu.memory_space<vmem>>, vector<1x8x128xf32>
      %49 = vector.shape_cast %48 : vector<1x8x128xf32> to vector<8x128xf32>
      %50 = vector.shape_cast %46 : vector<8x128xf32> to vector<1x8x128xf32>
      tpu.vector_store %arg8[%47, %c0_25, %c0_26], %50 {strides = array<i32>} : memref<2x8x128xf32, #tpu.memory_space<vmem>>, vector<1x8x128xf32>,
    }
    %c2_i32_13 = arith.constant 2 : i32
    return
  }
  func.func @transform_0(%arg0: i32, %arg1: i32) -> (i32, i32, i32) {
    %c0_i32 = arith.constant 0 : i32
    %c0_i32_0 = arith.constant 0 : i32
    return %arg0, %c0_i32, %arg1 : i32, i32, i32
  }
  func.func @transform_1(%arg0: i32, %arg1: i32) -> (i32, i32, i32, i32) {
    %c0_i32 = arith.constant 0 : i32
    %c0_i32_0 = arith.constant 0 : i32
    %c0_i32_1 = arith.constant 0 : i32
    return %arg0, %arg1, %c0_i32, %c0_i32_0 : i32, i32, i32, i32
  }
  func.func @transform_2(%arg0: i32, %arg1: i32) -> (i32, i32, i32) {
    %c0_i32 = arith.constant 0 : i32
    %c0_i32_0 = arith.constant 0 : i32
    %c0_i32_1 = arith.constant 0 : i32
    %c0_i32_2 = arith.constant 0 : i32
    return %c0_i32, %c0_i32_0, %c0_i32_1 : i32, i32, i32
  }
  func.func @transform_3(%arg0: i32, %arg1: i32) -> (i32, i32) {
    %c0_i32 = arith.constant 0 : i32
    %c0_i32_0 = arith.constant 0 : i32
    %c0_i32_1 = arith.constant 0 : i32
    return %c0_i32, %c0_i32_0 : i32, i32
  }
  func.func @transform_4(%arg0: i32, %arg1: i32) -> (i32, i32) {
    %c0_i32 = arith.constant 0 : i32
    %c0_i32_0 = arith.constant 0 : i32
    %c0_i32_1 = arith.constant 0 : i32
    return %c0_i32, %c0_i32_0 : i32, i32
  }
  func.func @transform_5(%arg0: i32, %arg1: i32) -> (i32, i32) {
    %c0_i32 = arith.constant 0 : i32
    %c0_i32_0 = arith.constant 0 : i32
    %c0_i32_1 = arith.constant 0 : i32
    return %c0_i32, %c0_i32_0 : i32, i32
  }
  func.func @transform_6(%arg0: i32, %arg1: i32) -> (i32, i32, i32) {
    %c0_i32 = arith.constant 0 : i32
    %c0_i32_0 = arith.constant 0 : i32
    return %arg0, %c0_i32, %arg1 : i32, i32, i32
  }
}

</mosaic_0001>

<bundles_post_ra>
// kernel: tpu_custom_call.1
= control target key start
LH: loop header
LB: loop body
LE: loop exit
PB: predicated region body
PF: predicated region fallthrough
CT: control target
= control target key end

     0   :  { %11 = vsyncpa [#allocation3], 0  ;;  %v36_v2 = vlaneseq  ;;  %s662_s15 = smov 0   ;;  %s713_s0 = inlined_call_operand.vmem [shape: f32[2,8,128], index: 0, kind: input, shape index: {}]   ;;  %s714_s1 = inlined_call_operand.vmem [shape: f32[2,1,8,2], index: 1, kind: input, shape index: {}]   ;;  %s715_s2 = inlined_call_operand.vmem [shape: f32[3,16,8], index: 2, kind: input, shape index: {}]   ;;  %s716_s3 = inlined_call_operand.vmem [shape: f32[16,1], index: 3, kind: input, shape index: {}]   ;;  %s717_s4 = inlined_call_operand.vmem [shape: f32[8,16], index: 4, kind: input, shape index: {}]   ;;  %s718_s5 = inlined_call_operand.vmem [shape: f32[8,1], index: 5, kind: input, shape index: {}]   ;;  %s719_s6 = inlined_call_operand.hbm [shape: f32[2,8,128], index: 6, kind: output, shape index: {}]  }
   0x1   :  { %v613_v0 = vld [vmem:[%s715_s2] sm:$0xff]  ;;  %v618_v1 = vld [vmem:[%s715_s2 + $0x8] sm:$0xff]  ;;  %v623_v3 = vld [vmem:[%s715_s2 + $0x10] sm:$0xff] }
   0x2   :  { %v628_v4 = vld [vmem:[%s715_s2 + $0x18] sm:$0xff]  ;;  %v633_v5 = vld [vmem:[%s715_s2 + $0x20] sm:$0xff]  ;;  %v638_v6 = vld [vmem:[%s715_s2 + $0x28] sm:$0xff]  ;;  %v650_v9 = vand.u32 127, %v36_v2 }
   0x3   :  { %v643_v7 = vld [vmem:[%s717_s4] sm:$0xff]  ;;  %v655_v10 = vld [vmem:[%s716_s3 + $0x8] sm:$0xff] }
   0x4   :  { %v648_v8 = vld [vmem:[%s716_s3] sm:$0xff] }
   0x5   :  { %v660_v11 = vld [vmem:[%s718_s5] sm:$0xff] }
   0x6 LB: > { %s445_s4 = sshll.u32 %s564_s15, 3  ;;  %vm62_vm0 = vcmask 64512   ;;  %v566_v18 = vmov 0   ;;  %s567_s5 = smov 1   ;;  %vm460_vm1 = vcmp.ge.s32.totalorder %v650_v9, 1  ;;  %vm461_vm2 = vcmp.lt.s32.totalorder %v650_v9, 127  ;;  %s564_s15 = sphi %s662_s15, %s45_s15  }
   0x7   : > { %s47_s3 = scalar_lea.vmem %s713_s0, %s445_s4  ;;  %481 = vmatprep.mubr.msk.f32.mxu0 %vm62_vm0, %v613_v0  ;;  %476 = vmatprep.mubr.msk.f32.mxu1 %vm62_vm0, %v623_v3  ;;  %s568_s18 = smov 127   ;;  %v569_v23 = vmov 0.0|0.0   ;;  %vm570_vm3 = vmmov 0   ;;  %v571_v24 = vmov 0.0   ;;  %vm339_vm4 = vcmask 130048  }
   0x8   : > { %v673_v12 = vld [vmem:[%s47_s3] sm:$0xff]  ;;  %520 = vset.pattern.permute.xlu1 %v566_v18  ;;  %521 = vset.pattern.permute.xlu0 %v566_v18  ;;  %s414_s19 = scalar_lea.vmem [#allocation2], %s445_s4  ;;  %s45_s15 = sadd.s32 1, %s564_s15  }
   0x9   : > { %v446_v13 = vmul.f32 -1.442695, %v673_v12  ;;  %310 = vperm.xlu1 %520, %v648_v8   ;;  %p42_p0 = scmp.ge.s32.totalorder %s45_s15, 2  }
   0xa   :  { %s572_s20 = smov (%p42_p0), [#allocation2]  }
   0xb   : > { %522 = vpow2.f32 %v446_v13  ;;  %s421_s21 = sshll.u32 (%p42_p0), %s572_s20, 4  ;;  %s422_s21 = int_to_ptr.vmem [resolvable:$true] %s421_s21 }
   0xc   :  { %s534_s22 = scalar_lea.vmem (%p42_p0), %s422_s21, 256  ;;  %p539_p2 = scmp.lt.s32.totalorder (%p42_p0), %s422_s21, %s422_s21 }
   0xd   : > { %315 = vperm.xlu1 %520, %v655_v10   ;;  %p535_p1 = scmp.ne.s32.totalorder (%p42_p0), %s422_s21, %s534_s22  ;;  %p540_p3 = scmp.lt.s32.totalorder (%p42_p0), %s534_s22, %s534_s22 }
   0xf   :  { %p541_p4 = por (%p42_p0), %p540_p3, %p539_p2 }
  0x11   :  { %p542_p5 = pnand (%p42_p0), %p541_p4, %p535_p1 }
  0x15   : > { %v523_v14 = vpop.eup %522 }
  0x16   : > { %v52_v15 = vadd.f32 1.0, %v523_v14 }
  0x18   : > { %524 = vrcp.f32 %v52_v15 }
  0x22   : > { %v525_v16 = vpop.eup %524 }
  0x23   : > { %v55_v17 = vmul.f32 %v525_v16, %v673_v12 }
  0x25   : > { %56 = vrot.lane.b32.xlu0 %v55_v17, %s567_s5  ;;  %474 = vmatprep.subr.mxu1 %v55_v17 }
  0x26   : > { %475 = vmatpush3.msra.mxu1 %v55_v17 }
  0x27   : > { %477 = vmatmul.mubr.msk.f32.vlgmr.msra.gmra.mrb[0].mxu1 %vm62_vm0, %v628_v4  ;;  %496 = vmatprep.subr.bf16.mxu1 %v569_v23 }
  0x28   : > { %493 = vmatprep.mubr.msk.f32.mxu1 %vm570_vm3, %v571_v24 }
  0x29   : > { %58 = vrot.lane.b32.xlu0 %v55_v17, %s568_s18 }
  0x2d   : > { %336 = vperm.xlu0 %521, %v660_v11  }
  0x88   : > { %v311_v25 = vpop.permute.xlu1 %310 }
  0x8c   : > { %v316_v29 = vpop.permute.xlu1 %315 }
  0x97   : > { %v57_v19 = vpop.permute.xlu0 %56 }
  0x98   : > { %479 = vmatprep.subr.msk.mxu0 %vm460_vm1, %v57_v19 }
  0x99   : > { %480 = vmatpush3.msk.msra.mxu0 %vm460_vm1, %v57_v19 }
  0x9a   : > { %482 = vmatmul.mubr.msk.f32.vlgmr.msra.gmra.mrb[0].mxu0 %vm62_vm0, %v618_v1 }
  0x9b   : > { %v59_v20 = vpop.permute.xlu0 %58  ;;  %486 = vmatprep.mubr.msk.f32.mxu0 %vm62_vm0, %v633_v5 }
  0x9c   : > { %484 = vmatprep.subr.msk.mxu0 %vm461_vm2, %v59_v20 }
  0x9d   : > { %485 = vmatpush3.msk.msra.mxu0 %vm461_vm2, %v59_v20 }
  0xa2   : > { %487 = vmatmul.mubr.msk.f32.vlgmr.msra.gmra.mrb[0].mxu0 %vm62_vm0, %v638_v6 }
  0xac   : > { %v337_v44 = vpop.permute.xlu0 %336 }
  0xfa   : > { %v478_v21 = vpop.f32.mrb[0].mxu1 }
  0xfb   : > { %v135_v22 = vpop.f32.mrb[1].mxu1 }
 0x175   : > { %v488_v26 = vpop.f32.mrb[0].mxu0 }
 0x176   : > { %v499_v27 = vadd.f32 %v488_v26, %v478_v21  ;;  %v297_v28 = vpop.f32.mrb[1].mxu0 }
 0x177   : > { %v500_v30 = vadd.f32 %v297_v28, %v135_v22 }
 0x178   : > { %v319_v31 = vadd.f32 %v499_v27, %v316_v29 }
 0x179   : > { %v318_v32 = vadd.f32 %v500_v30, %v311_v25 }
 0x17a   : > { %v458_v33 = vmul.f32 -1.442695, %v319_v31 }
 0x17b   : > { %v457_v34 = vmul.f32 -1.442695, %v318_v32 }
 0x17c   : > { %526 = vpow2.f32 %v458_v33 }
 0x17d   : > { %528 = vpow2.f32 %v457_v34 }
 0x186   : > { %v527_v35 = vpop.eup %526 }
 0x187   : > { %v529_v36 = vpop.eup %528  ;;  %v327_v37 = vadd.f32 1.0, %v527_v35 }
 0x188   : > { %v326_v38 = vadd.f32 1.0, %v529_v36 }
 0x189   : > { %530 = vrcp.f32 %v327_v37 }
 0x18a   : > { %532 = vrcp.f32 %v326_v38 }
 0x193   : > { %v531_v39 = vpop.eup %530 }
 0x194   : > { %v533_v40 = vpop.eup %532  ;;  %v333_v41 = vmul.f32 %v531_v39, %v319_v31 }
 0x195   : > { %v332_v42 = vmul.f32 %v533_v40, %v318_v32 }
 0x197   : > { %v497_v43 = vpack.c.bf16 %v333_v41, %v332_v42 }
 0x199   : > { %498 = vmatpush3.bf16.msra.mxu1 %v497_v43 }
 0x19c   : > { %494 = vmatmul.mubr.msk.f32.vlgmr.msra.gmra.mrb[2].mxu1 %vm339_vm4, %v643_v7 }
 0x26e   :  { %44 = sbr.rel (!%p42_p0) target bundleno = 6 (0x6), region = 55 }
 0x26f   : > { %v409_v45 = vpop.f32.mrb[2].mxu1 }
 0x270   : > { %v410_v46 = vadd.f32 %v409_v45, %v337_v44  ;;  %v495_v47 = vpop.f32.mrb[3].mxu1 }
 0x272   : > { %v413_v48 = vadd.f32 %v410_v46, %v673_v12 }
 0x274   : > { %415 = vst [vmem:[%s414_s19] sm:$0xff] %v413_v48 }
 0x275   :  { %545 = shalt.err (!%p542_p5)
}
 0x276   :  { %s546_s24 = scalar_lea.hbm %s719_s6, 256 }
 0x277   :  { %p547_p6 = scmp.ne.s32.totalorder %s719_s6, %s546_s24  ;;  %p550_p7 = scmp.lt.u32.totalorder %s546_s24, %s719_s6 }
 0x279   :  { %p552_p8 = pnand %p550_p7, %p547_p6 }
 0x27b   :  { %555 = shalt.err (!%p552_p8)
}
 0x27c   :  { %s573_s0 = smov 128   ;;  %s574_s29 = smov 8  }
 0x27d   :  { %427 = dma.vmem_to_hbm [thread:$0]  %s422_s21, 256, %s719_s6, [#allocation3], %s573_s0, %s573_s0, %s574_s29  }
 0x27e   :  { %560 = dma.done.wait [#allocation3], 256  }
 0x27f   :  { %561 = vsyncadd [#allocation3], 4294967040 }
 0x280   :  { %431 = vsyncpa [#allocation3], 1 }

</bundles_post_ra>
